<compile_context>
chip_gen: v7x
topology: tpu7x:2x2x1
jax: 0.10.0
libtpu: 0.0.40
codegen_flags: <defaults>
</compile_context>

<pallas_src>
import jax
import jax.numpy as jnp
import numpy as np
from jax import lax
from jax.experimental import pallas as pl
from jax.experimental.pallas import tpu as pltpu


def _vq_kernel(z_ref, emb_ref, e2h_ref, zq_ref, idx_ref):
    """z (TN, D), emb (K, D), e2h (K, 1) -> zq (TN, D), idx (1, TN) int32.

    All VPU work (score, min, iota, one-hot) is done in the transposed (K, TN)
    orientation so the tiny K axis sits on sublanes instead of lane-padding every
    (TN, K) intermediate to 128 lanes.
    """
    z = z_ref[...].astype(jnp.float32)          # (TN, D)
    e = emb_ref[...].astype(jnp.float32)        # (K, D)
    e2h = e2h_ref[...]                          # (K, 1) hoisted 0.5*||e||^2
    TN = z_ref.shape[0]
    K = emb_ref.shape[0]

    # argmin_k ||z - e_k||^2 == argmin_k (0.5*||e_k||^2 - z.e_k); ||z||^2 is
    # row-constant (dropped), the factor 2 is folded into the hoisted norm.
    ze_t = lax.dot_general(e, z, dimension_numbers=(((1,), (1,)), ((), ())),
                           preferred_element_type=jnp.float32)       # (K, TN)  MXU
    score = e2h - ze_t                                               # (K, TN)

    # argmin over the (sublane) K axis with first-occurrence tie-break, matching
    # torch.argmin; the result is already lane-dense (1, TN).
    s_min = jnp.min(score, axis=0, keepdims=True)                    # (1, TN)
    row = lax.broadcasted_iota(jnp.int32, (K, TN), 0)                # (K, TN)
    idx_lane = jnp.min(jnp.where(score == s_min, row, jnp.int32(K)),
                       axis=0, keepdims=True)                        # (1, TN)
    idx_ref[...] = idx_lane

    # one-hot^T @ codebook == embedding gather, one lhs-transposed MXU contraction.
    onehot = (row == idx_lane).astype(jnp.float32)                   # (K, TN)
    z_q = lax.dot_general(onehot, e, dimension_numbers=(((0,), (0,)), ((), ())),
                          preferred_element_type=jnp.float32)        # (TN, D)
    zq_ref[...] = z_q.astype(zq_ref.dtype)


def vector_quantizer_forward(z, embedding_weight, structure_bank, structures, beta,
                             *, block_rows=2048, vmem_limit_bytes=48 * 1024 * 1024):
    """Pallas implementation of VectorQuantizer.forward.

    Returns (loss, z_q, new_structure_bank); forward values match the torch module
    (the torch module mutates structure_bank in place, here it is returned).
    """
    n_e, e_dim = embedding_weight.shape

    # torch: z.view(-1, self.e_dim) on a contiguous NCHW tensor -> row-major flatten.
    z_flat = z.reshape(-1, e_dim)
    N = z_flat.shape[0]

    # Row tile: one full block for small N, otherwise a multiple-of-128 tile
    # (lane-dense idx block needs last dim % 128 == 0 unless it equals the full dim;
    # z/z_q sublane dim needs % 8).  No padding: the grid handles a ragged last
    # block, OOB reads are per-row garbage that is discarded, OOB writes dropped.
    if N <= block_rows:
        tn = N
    else:
        tn = max(128, (block_rows // 128) * 128)
    grid = (pl.cdiv(N, tn),)

    # hoisted 0.5*||e||^2, transposed to (K, 1); constant index_map -> VMEM-resident.
    e2_half = 0.5 * jnp.sum(embedding_weight.astype(jnp.float32) ** 2,
                            axis=1, keepdims=True)                    # (K, 1)

    zq_flat, idx_row = pl.pallas_call(
        _vq_kernel,
        grid=grid,
        in_specs=[
            pl.BlockSpec((tn, e_dim), lambda i: (i, 0)),     # z rows: pipelined
            pl.BlockSpec((n_e, e_dim), lambda i: (0, 0)),    # codebook: VMEM-resident
            pl.BlockSpec((n_e, 1), lambda i: (0, 0)),        # 0.5*||e||^2: resident
        ],
        out_specs=(
            pl.BlockSpec((tn, e_dim), lambda i: (i, 0)),     # z_q rows
            pl.BlockSpec((1, tn), lambda i: (0, i)),         # lane-dense indices
        ),
        out_shape=(
            jax.ShapeDtypeStruct((N, e_dim), z.dtype),
            jax.ShapeDtypeStruct((1, N), jnp.int32),
        ),
        compiler_params=pltpu.CompilerParams(
            dimension_semantics=("parallel",),
            vmem_limit_bytes=vmem_limit_bytes,   # <= v7x 64 MiB physical; tiles ~1 MiB
        ),
    )(z_flat, embedding_weight, e2_half)

    zq = zq_flat.reshape(z.shape)
    idx = idx_row[0]

    # loss = mean((sg[z_q] - z)^2) + beta * mean((z_q - sg[z])^2)  (plain JAX so the
    # stop-gradient split matches the torch expression term-for-term)
    # TODO(synk): gradients do not flow through pallas_call itself (no custom VJP);
    # forward value matches torch exactly, training parity would need a custom VJP.
    loss = (jnp.mean((lax.stop_gradient(zq) - z) ** 2)
            + beta * jnp.mean((zq - lax.stop_gradient(z)) ** 2))

    # straight-through estimator: z_q = z + sg(z_q - z)
    z_q = z + lax.stop_gradient(zq - z)

    # in-place buffer update: structure_bank[idx] = structures.detach()
    # TODO(synk): with duplicate indices the winning row is unspecified in JAX scatter
    # (torch in-place indexing is effectively last-write-wins).
    new_structure_bank = structure_bank.at[idx].set(lax.stop_gradient(structures))

    # TODO(synk): perplexity is computed-then-discarded in the torch forward (not
    # returned, no side effect), so it is omitted here.

    return loss, z_q, new_structure_bank


if __name__ == "__main__":
    key = jax.random.PRNGKey(0)
    k_emb, k_bank, k_z, k_struct = jax.random.split(key, 4)

    # module hyper-parameters (small, consistent with __init__)
    n_e = 16
    e_dim_base = 4
    mul_num = 10
    e_dim = e_dim_base * mul_num            # self.e_dim = e_dim * mul_num = 40
    beta = 0.25
    size = 32
    downsampling_num = 4
    s = size // 2 ** downsampling_num       # 2

    # deterministic parameter init (matches __init__ shapes & distributions)
    embedding_weight = jax.random.uniform(
        k_emb, (n_e, e_dim), jnp.float32, -1.0 / n_e, 1.0 / n_e)
    structure_bank = jax.random.normal(k_bank, (n_e, 128, s, s), jnp.float32)

    # inputs: C == e_dim so B*C*H*W divides e_dim; W=14 makes N=448 (not a multiple
    # of 128) so the ragged-last-block path is exercised.
    B, C, H, W = 2, e_dim, 16, 14
    z = jax.random.normal(k_z, (B, C, H, W), jnp.float32)
    N = (B * C * H * W) // e_dim            # 448 flattened rows
    structures = jax.random.normal(k_struct, (N, 128, s, s), jnp.float32)

    # pure-JAX reference (full torch distance formula)
    z_flat = z.reshape(-1, e_dim)
    d_ref = (jnp.sum(z_flat ** 2, axis=1, keepdims=True)
             + jnp.sum(embedding_weight ** 2, axis=1)
             - 2.0 * z_flat @ embedding_weight.T)
    idx_ref = jnp.argmin(d_ref, axis=1)
    zq_ref = embedding_weight[idx_ref].reshape(z.shape)
    loss_ref = (1.0 + beta) * jnp.mean((zq_ref - z) ** 2)

    # config 1: default tile -> single block (tn = N = 448, grid = (1,))
    fwd_big = jax.jit(lambda z_, w_, bank_, st_: vector_quantizer_forward(
        z_, w_, bank_, st_, beta))
    # config 2: small tile -> pipelined grid = (4,) with a ragged last block
    fwd_small = jax.jit(lambda z_, w_, bank_, st_: vector_quantizer_forward(
        z_, w_, bank_, st_, beta, block_rows=128))

    for fwd in (fwd_big, fwd_small):
        loss, z_q, new_bank = fwd(z, embedding_weight, structure_bank, structures)
        jax.block_until_ready((loss, z_q, new_bank))
        np.testing.assert_allclose(np.asarray(z_q), np.asarray(zq_ref),
                                   rtol=1e-5, atol=1e-5)
        np.testing.assert_allclose(np.asarray(loss), np.asarray(loss_ref),
                                   rtol=1e-5, atol=1e-6)

    print("KERNEL_OK")
</pallas_src>

<mosaic_0001>
module attributes {stable_mosaic.version = 11 : i64} {
  func.func @_vq_kernel(%arg0: i32, %arg1: memref<448x40xf32, #tpu.memory_space<vmem>>, %arg2: memref<16x40xf32, #tpu.memory_space<vmem>>, %arg3: memref<16x1xf32, #tpu.memory_space<vmem>>, %arg4: memref<448x40xf32, #tpu.memory_space<vmem>>, %arg5: memref<1x448xi32, #tpu.memory_space<vmem>>) attributes {dimension_semantics = [#tpu.dimension_semantics<parallel>], iteration_bounds = array<i64: 1>, scalar_prefetch = 0 : i64, scratch_operands = 0 : i64, tpu.core_type = #tpu.core_type<tc>, window_params = [{transform_indices = @transform_0, window_bounds = array<i64: 448, 40>}, {pipeline_mode = #tpu.pipeline_mode<synchronous>, transform_indices = @transform_1, window_bounds = array<i64: 16, 40>}, {pipeline_mode = #tpu.pipeline_mode<synchronous>, transform_indices = @transform_2, window_bounds = array<i64: 16, 1>}, {transform_indices = @transform_3, window_bounds = array<i64: 448, 40>}, {transform_indices = @transform_4, window_bounds = array<i64: 1, 448>}]} {
    %c0 = arith.constant 0 : index
    %c0_0 = arith.constant 0 : index
    %0 = vector.load %arg1[%c0, %c0_0] : memref<448x40xf32, #tpu.memory_space<vmem>>, vector<448x40xf32>
    %c0_1 = arith.constant 0 : index
    %c0_2 = arith.constant 0 : index
    %1 = vector.load %arg2[%c0_1, %c0_2] : memref<16x40xf32, #tpu.memory_space<vmem>>, vector<16x40xf32>
    %c0_3 = arith.constant 0 : index
    %c0_4 = arith.constant 0 : index
    %2 = vector.load %arg3[%c0_3, %c0_4] : memref<16x1xf32, #tpu.memory_space<vmem>>, vector<16x1xf32>
    %cst = arith.constant dense<0.000000e+00> : vector<16x448xf32>
    %3 = tpu.matmul %1, %0, %cst {dimension_numbers = #tpu.dot_dimension_numbers<[1], [1], [0], [0], [0, 0, 1, 0], [], []>} : vector<16x40xf32>, vector<448x40xf32>, vector<16x448xf32> -> vector<16x448xf32>
    %4 = vector.broadcast %2 : vector<16x1xf32> to vector<16x448xf32>
    %5 = arith.subf %4, %3 : vector<16x448xf32>
    %cst_5 = arith.constant dense<0x7F800000> : vector<448xf32>
    %6 = vector.multi_reduction <minimumf>, %5, %cst_5 [0] : vector<16x448xf32> to vector<448xf32>
    %7 = vector.shape_cast %6 : vector<448xf32> to vector<1x448xf32>
    %8 = tpu.iota {dimensions = array<i32: 0>} : vector<16x448xi32>
    %9 = vector.broadcast %7 : vector<1x448xf32> to vector<16x448xf32>
    %10 = arith.cmpf oeq, %5, %9 : vector<16x448xf32>
    %c16_i32 = arith.constant 16 : i32
    %11 = vector.broadcast %c16_i32 : i32 to vector<16x448xi32>
    %12 = arith.select %10, %8, %11 : vector<16x448xi1>, vector<16x448xi32>
    %cst_6 = arith.constant dense<2147483647> : vector<448xi32>
    %13 = vector.multi_reduction <minsi>, %12, %cst_6 [0] : vector<16x448xi32> to vector<448xi32>
    %14 = vector.shape_cast %13 : vector<448xi32> to vector<1x448xi32>
    %c0_7 = arith.constant 0 : index
    %c0_8 = arith.constant 0 : index
    %15 = vector.load %arg5[%c0_7, %c0_8] : memref<1x448xi32, #tpu.memory_space<vmem>>, vector<1x448xi32>
    tpu.vector_store %arg5[%c0_7, %c0_8], %14 {strides = array<i32>} : memref<1x448xi32, #tpu.memory_space<vmem>>, vector<1x448xi32>,
    %16 = vector.broadcast %14 : vector<1x448xi32> to vector<16x448xi32>
    %17 = arith.cmpi eq, %8, %16 : vector<16x448xi32>
    %18 = arith.extui %17 : vector<16x448xi1> to vector<16x448xi32>
    %19 = arith.sitofp %18 : vector<16x448xi32> to vector<16x448xf32>
    %cst_9 = arith.constant dense<0.000000e+00> : vector<448x40xf32>
    %20 = tpu.matmul %19, %1, %cst_9 {dimension_numbers = #tpu.dot_dimension_numbers<[0], [0], [1], [1], [0, 1, 1, 1], [], []>} : vector<16x448xf32>, vector<16x40xf32>, vector<448x40xf32> -> vector<448x40xf32>
    %c0_10 = arith.constant 0 : index
    %c0_11 = arith.constant 0 : index
    %21 = vector.load %arg4[%c0_10, %c0_11] : memref<448x40xf32, #tpu.memory_space<vmem>>, vector<448x40xf32>
    tpu.vector_store %arg4[%c0_10, %c0_11], %20 {strides = array<i32>} : memref<448x40xf32, #tpu.memory_space<vmem>>, vector<448x40xf32>,
    return
  }
  func.func @transform_0(%arg0: i32) -> (i32, i32) {
    %c0_i32 = arith.constant 0 : i32
    %c0_i32_0 = arith.constant 0 : i32
    return %arg0, %c0_i32 : i32, i32
  }
  func.func @transform_1(%arg0: i32) -> (i32, i32) {
    %c0_i32 = arith.constant 0 : i32
    %c0_i32_0 = arith.constant 0 : i32
    %c0_i32_1 = arith.constant 0 : i32
    return %c0_i32, %c0_i32_0 : i32, i32
  }
  func.func @transform_2(%arg0: i32) -> (i32, i32) {
    %c0_i32 = arith.constant 0 : i32
    %c0_i32_0 = arith.constant 0 : i32
    %c0_i32_1 = arith.constant 0 : i32
    return %c0_i32, %c0_i32_0 : i32, i32
  }
  func.func @transform_3(%arg0: i32) -> (i32, i32) {
    %c0_i32 = arith.constant 0 : i32
    %c0_i32_0 = arith.constant 0 : i32
    return %arg0, %c0_i32 : i32, i32
  }
  func.func @transform_4(%arg0: i32) -> (i32, i32) {
    %c0_i32 = arith.constant 0 : i32
    %c0_i32_0 = arith.constant 0 : i32
    return %c0_i32, %arg0 : i32, i32
  }
}

</mosaic_0001>

<bundles_post_ra>
// kernel: _lambda_.1
= control target key start
LH: loop header
LB: loop body
LE: loop exit
PB: predicated region body
PF: predicated region fallthrough
CT: control target
= control target key end

     0   :  { %vm76_vm0 = vcmask 326656   ;;  %v1775_v0 = vmov 0.0|0.0   ;;  %v1776_v4 = vmov 0.0   ;;  %v1777_v9 = vmov 0   ;;  %s2443_s0 = inlined_call_operand.vmem [shape: f32[448,40], index: 0, kind: input, shape index: {}]   ;;  %s2444_s1 = inlined_call_operand.vmem [shape: f32[16,40], index: 1, kind: input, shape index: {}]   ;;  %s2445_s2 = inlined_call_operand.vmem [shape: f32[16,1], index: 2, kind: input, shape index: {}]   ;;  %s2446_s4 = inlined_call_operand.vmem [shape: s32[1,448], index: 4, kind: output, shape index: {1}]   ;;  %s2447_s3 = inlined_call_operand.vmem [shape: f32[448,40], index: 3, kind: output, shape index: {0}]  }
   0x1   :  { %1632 = vmatprep.subr.bf16.mxu1 %v1775_v0  ;;  %v32_v1 = vld [vmem:[%s2443_s0 + $0x80] sm:$0xff]  ;;  %v33_v2 = vld [vmem:[%s2443_s0 + $0x88] sm:$0xff]  ;;  %vm1813_vm1 = vmpackc.low %vm76_vm0, %vm76_vm0  ;;  %392 = vmatprep.mubr.f32.mxu1 %v1776_v4  ;;  %vm444_vm12 = vcmask 523264  }
   0x2   :  { %v1584_v5 = vpack.c.bf16 %v33_v2, %v32_v1  ;;  %v48_v6 = vld [vmem:[%s2443_s0 + $0x100] sm:$0xff]  ;;  %v49_v7 = vld [vmem:[%s2443_s0 + $0x108] sm:$0xff]  ;;  %1690 = vset.pattern.permute.xlu0 %v1777_v9  ;;  %v34_v12 = vld [vmem:[%s2443_s0 + $0x90] sm:$0xff] }
   0x3   :  { %v16_v8 = vld [vmem:[%s2443_s0] sm:$0xff]  ;;  %v1633_v10 = vpack.c.bf16 %v49_v7, %v48_v6  ;;  %v17_v11 = vld [vmem:[%s2443_s0 + $0x8] sm:$0xff]  ;;  %v35_v13 = vld [vmem:[%s2443_s0 + $0x98] sm:$0xff] }
   0x4   :  { %1586 = vmatprep.subr.msk.bf16.mxu0 %vm1813_vm1, %v1584_v5  ;;  %v1587_v14 = vpack.c.bf16 %v17_v11, %v16_v8  ;;  %v1590_v15 = vpack.c.bf16 %v35_v13, %v34_v12  ;;  %v50_v16 = vld [vmem:[%s2443_s0 + $0x110] sm:$0xff]  ;;  %v51_v17 = vld [vmem:[%s2443_s0 + $0x118] sm:$0xff]  ;;  %v36_v20 = vld [vmem:[%s2443_s0 + $0xa0] sm:$0xff] }
   0x5   :  { %1635 = vmatpush1.bf16.xpose.msk.msra.mxu1 %vm1813_vm1, %v1633_v10  ;;  %v18_v18 = vld [vmem:[%s2443_s0 + $0x10] sm:$0xff]  ;;  %v19_v19 = vld [vmem:[%s2443_s0 + $0x18] sm:$0xff]  ;;  %v37_v21 = vld [vmem:[%s2443_s0 + $0xa8] sm:$0xff]  ;;  %v1637_v22 = vpack.c.bf16 %v51_v17, %v50_v16 }
   0x6   :  { %1589 = vmatpush3.bf16.xpose.msk.msra.mxu0 %vm1813_vm1, %v1587_v14  ;;  %1636 = vmatprep.subr.bf16.mxu1 %v1775_v0  ;;  %v1593_v23 = vpack.c.bf16 %v19_v19, %v18_v18  ;;  %v1596_v24 = vpack.c.bf16 %v37_v21, %v36_v20  ;;  %v52_v25 = vld [vmem:[%s2443_s0 + $0x120] sm:$0xff]  ;;  %v53_v26 = vld [vmem:[%s2443_s0 + $0x128] sm:$0xff]  ;;  %v38_v29 = vld [vmem:[%s2443_s0 + $0xb0] sm:$0xff] }
   0x7   :  { %1592 = vmatprep.subr.msk.bf16.mxu0 %vm1813_vm1, %v1590_v15  ;;  %v20_v27 = vld [vmem:[%s2443_s0 + $0x20] sm:$0xff]  ;;  %v21_v28 = vld [vmem:[%s2443_s0 + $0x28] sm:$0xff]  ;;  %v39_v30 = vld [vmem:[%s2443_s0 + $0xb8] sm:$0xff]  ;;  %v1641_v31 = vpack.c.bf16 %v53_v26, %v52_v25 }
   0x8   :  { %v1891_v32 = vld [vmem:[%s2444_s1] sm:$0xff]  ;;  %v1599_v33 = vpack.c.bf16 %v21_v28, %v20_v27  ;;  %v1602_v34 = vpack.c.bf16 %v39_v30, %v38_v29  ;;  %v54_v36 = vld [vmem:[%s2443_s0 + $0x130] sm:$0xff]  ;;  %v55_v37 = vld [vmem:[%s2443_s0 + $0x138] sm:$0xff] }
   0x9   :  { %1434 = vmatprep.mubr.msk.f32.mxu0 %vm76_vm0, %v1891_v32  ;;  %v74_v35 = vld [vmem:[%s2445_s2] sm:$0xff]  ;;  %v75_v38 = vld [vmem:[%s2445_s2 + $0x8] sm:$0xff]  ;;  %v22_v39 = vld [vmem:[%s2443_s0 + $0x30] sm:$0xff]  ;;  %v1645_v43 = vpack.c.bf16 %v55_v37, %v54_v36 }
   0xa   :  { %407 = vperm.xlu0 %1690, %v74_v35   ;;  %v23_v40 = vld [vmem:[%s2443_s0 + $0x38] sm:$0xff]  ;;  %v40_v41 = vld [vmem:[%s2443_s0 + $0xc0] sm:$0xff]  ;;  %v41_v42 = vld [vmem:[%s2443_s0 + $0xc8] sm:$0xff] }
   0xb   :  { %v1605_v44 = vpack.c.bf16 %v23_v40, %v22_v39  ;;  %v1608_v45 = vpack.c.bf16 %v41_v42, %v40_v41  ;;  %v56_v46 = vld [vmem:[%s2443_s0 + $0x140] sm:$0xff]  ;;  %v57_v47 = vld [vmem:[%s2443_s0 + $0x148] sm:$0xff]  ;;  %v42_v50 = vld [vmem:[%s2443_s0 + $0xd0] sm:$0xff] }
   0xc   :  { %v24_v48 = vld [vmem:[%s2443_s0 + $0x40] sm:$0xff]  ;;  %v25_v49 = vld [vmem:[%s2443_s0 + $0x48] sm:$0xff]  ;;  %v43_v51 = vld [vmem:[%s2443_s0 + $0xd8] sm:$0xff]  ;;  %v1649_v52 = vpack.c.bf16 %v57_v47, %v56_v46 }
   0xd   :  { %1639 = vmatpush1.bf16.xpose.msk.msra.mxu1 %vm1813_vm1, %v1637_v22  ;;  %v1611_v53 = vpack.c.bf16 %v25_v49, %v24_v48  ;;  %v1614_v54 = vpack.c.bf16 %v43_v51, %v42_v50  ;;  %v58_v55 = vld [vmem:[%s2443_s0 + $0x150] sm:$0xff]  ;;  %v59_v56 = vld [vmem:[%s2443_s0 + $0x158] sm:$0xff]  ;;  %v44_v59 = vld [vmem:[%s2443_s0 + $0xe0] sm:$0xff] }
   0xe   :  { %1595 = vmatpush3.bf16.xpose.msk.msra.mxu0 %vm1813_vm1, %v1593_v23  ;;  %1640 = vmatprep.subr.bf16.mxu1 %v1775_v0  ;;  %v26_v57 = vld [vmem:[%s2443_s0 + $0x50] sm:$0xff]  ;;  %v27_v58 = vld [vmem:[%s2443_s0 + $0x58] sm:$0xff]  ;;  %v45_v60 = vld [vmem:[%s2443_s0 + $0xe8] sm:$0xff]  ;;  %v1653_v61 = vpack.c.bf16 %v59_v56, %v58_v55 }
   0xf   :  { %1598 = vmatprep.subr.msk.bf16.mxu0 %vm1813_vm1, %v1596_v24  ;;  %412 = vperm.xlu0 %1690, %v75_v38   ;;  %v1617_v62 = vpack.c.bf16 %v27_v58, %v26_v57  ;;  %v1620_v63 = vpack.c.bf16 %v45_v60, %v44_v59  ;;  %v60_v1 = vld [vmem:[%s2443_s0 + $0x160] sm:$0xff]  ;;  %v61_v2 = vld [vmem:[%s2443_s0 + $0x168] sm:$0xff]  ;;  %v46_v7 = vld [vmem:[%s2443_s0 + $0xf0] sm:$0xff] }
  0x10   :  { %v28_v5 = vld [vmem:[%s2443_s0 + $0x60] sm:$0xff]  ;;  %v29_v6 = vld [vmem:[%s2443_s0 + $0x68] sm:$0xff]  ;;  %v47_v8 = vld [vmem:[%s2443_s0 + $0xf8] sm:$0xff]  ;;  %v1657_v9 = vpack.c.bf16 %v61_v2, %v60_v1 }
  0x11   :  { %v1623_v10 = vpack.c.bf16 %v29_v6, %v28_v5  ;;  %v1626_v11 = vpack.c.bf16 %v47_v8, %v46_v7  ;;  %v62_v12 = vld [vmem:[%s2443_s0 + $0x170] sm:$0xff]  ;;  %v63_v13 = vld [vmem:[%s2443_s0 + $0x178] sm:$0xff]  ;;  %v64_v18 = vld [vmem:[%s2443_s0 + $0x180] sm:$0xff] }
  0x12   :  { %v30_v14 = vld [vmem:[%s2443_s0 + $0x70] sm:$0xff]  ;;  %v31_v15 = vld [vmem:[%s2443_s0 + $0x78] sm:$0xff]  ;;  %v1661_v16 = vpack.c.bf16 %v63_v13, %v62_v12  ;;  %v65_v19 = vld [vmem:[%s2443_s0 + $0x188] sm:$0xff] }
  0x13   :  { %v1629_v17 = vpack.c.bf16 %v31_v15, %v30_v14  ;;  %v1665_v20 = vpack.c.bf16 %v65_v19, %v64_v18  ;;  %v2034_v21 = vld [vmem:[%s2444_s1 + $0x8] sm:$0xff]  ;;  %v66_v22 = vld [vmem:[%s2443_s0 + $0x190] sm:$0xff]  ;;  %v67_v23 = vld [vmem:[%s2443_s0 + $0x198] sm:$0xff] }
  0x14   :  { %v1669_v24 = vpack.c.bf16 %v67_v23, %v66_v22  ;;  %v68_v25 = vld [vmem:[%s2443_s0 + $0x1a0] sm:$0xff]  ;;  %v69_v26 = vld [vmem:[%s2443_s0 + $0x1a8] sm:$0xff]  ;;  %v70_v28 = vld [vmem:[%s2443_s0 + $0x1b0] sm:$0xff] }
  0x15   :  { %1643 = vmatpush1.bf16.xpose.msk.msra.mxu1 %vm1813_vm1, %v1641_v31  ;;  %v1673_v27 = vpack.c.bf16 %v69_v26, %v68_v25  ;;  %v71_v29 = vld [vmem:[%s2443_s0 + $0x1b8] sm:$0xff] }
  0x16   :  { %1601 = vmatpush3.bf16.xpose.msk.msra.mxu0 %vm1813_vm1, %v1599_v33  ;;  %1644 = vmatprep.subr.bf16.mxu1 %v1775_v0  ;;  %v1677_v30 = vpack.c.bf16 %v71_v29, %v70_v28 }
  0x17   :  { %1604 = vmatprep.subr.msk.bf16.mxu0 %vm1813_vm1, %v1602_v34 }
  0x1d   :  { %1647 = vmatpush1.bf16.xpose.msk.msra.mxu1 %vm1813_vm1, %v1645_v43 }
  0x1e   :  { %1607 = vmatpush3.bf16.xpose.msk.msra.mxu0 %vm1813_vm1, %v1605_v44  ;;  %1648 = vmatprep.subr.bf16.mxu1 %v1775_v0  ;;  %v454_v44 = vlaneseq }
  0x1f   :  { %1610 = vmatprep.subr.msk.bf16.mxu0 %vm1813_vm1, %v1608_v45 }
  0x20   :  { %v2077_v49 = vshrl.u32 %v454_v44, 7 }
  0x25   :  { %1651 = vmatpush1.bf16.xpose.msk.msra.mxu1 %vm1813_vm1, %v1649_v52 }
  0x26   :  { %1613 = vmatpush3.bf16.xpose.msk.msra.mxu0 %vm1813_vm1, %v1611_v53  ;;  %1652 = vmatprep.subr.bf16.mxu1 %v1775_v0 }
  0x27   :  { %1616 = vmatprep.subr.msk.bf16.mxu0 %vm1813_vm1, %v1614_v54  ;;  %v2080_v54 = vadd.s32 8, %v2077_v49 }
  0x2d   :  { %1655 = vmatpush1.bf16.xpose.msk.msra.mxu1 %vm1813_vm1, %v1653_v61 }
  0x2e   :  { %1619 = vmatpush3.bf16.xpose.msk.msra.mxu0 %vm1813_vm1, %v1617_v62  ;;  %1656 = vmatprep.subr.bf16.mxu1 %v1775_v0 }
  0x2f   :  { %1622 = vmatprep.subr.msk.bf16.mxu0 %vm1813_vm1, %v1620_v63 }
  0x35   :  { %1659 = vmatpush1.bf16.xpose.msk.msra.mxu1 %vm1813_vm1, %v1657_v9 }
  0x36   :  { %1625 = vmatpush3.bf16.xpose.msk.msra.mxu0 %vm1813_vm1, %v1623_v10  ;;  %1660 = vmatprep.subr.bf16.mxu1 %v1775_v0 }
  0x37   :  { %1628 = vmatprep.subr.msk.bf16.mxu0 %vm1813_vm1, %v1626_v11 }
  0x3d   :  { %1663 = vmatpush1.bf16.xpose.msk.msra.mxu1 %vm1813_vm1, %v1661_v16 }
  0x3e   :  { %1631 = vmatpush3.bf16.xpose.msk.msra.mxu0 %vm1813_vm1, %v1629_v17  ;;  %1664 = vmatprep.subr.bf16.mxu1 %v1775_v0 }
  0x45   :  { %1435 = vmatmul.mubr.msk.f32.vlgmr.msra.gmra.mrb[0].mxu0 %vm76_vm0, %v1891_v32  ;;  %1667 = vmatpush1.bf16.xpose.msk.msra.mxu1 %vm1813_vm1, %v1665_v20 }
  0x46   :  { %1436 = vmatprep.mubr.msk.f32.mxu0 %vm76_vm0, %v2034_v21  ;;  %1668 = vmatprep.subr.bf16.mxu1 %v1775_v0 }
  0x49   :  { %1437 = vmatmul.mubr.msk.f32.gmra.mrb[2].mxu0 %vm76_vm0, %v2034_v21 }
  0x4d   :  { %1671 = vmatpush1.bf16.xpose.msk.msra.mxu1 %vm1813_vm1, %v1669_v24 }
  0x4e   :  { %1672 = vmatprep.subr.bf16.mxu1 %v1775_v0 }
  0x55   :  { %1675 = vmatpush1.bf16.xpose.msk.msra.mxu1 %vm1813_vm1, %v1673_v27 }
  0x56   :  { %1676 = vmatprep.subr.bf16.mxu1 %v1775_v0 }
  0x5d   :  { %1679 = vmatpush1.bf16.xpose.msk.msra.mxu1 %vm1813_vm1, %v1677_v30 }
  0x64   :  { %1336 = vmatmul.mubr.msk.f32.vlgmr.msra.gmra.mrb[0].mxu1 %vm76_vm0, %v1891_v32 }
  0x65   :  { %398 = vmatprep.mubr.f32.mxu1 %v1776_v4 }
  0x68   :  { %1337 = vmatmul.mubr.msk.f32.gmra.mrb[2].mxu1 %vm76_vm0, %v2034_v21 }
  0x89   :  { %v408_v0 = vpop.permute.xlu0 %407 }
  0x8e   :  { %v413_v35 = vpop.permute.xlu0 %412 }
 0x118   :  { %v317_v31 = vpop.f32.mrb[0].mxu0 }
 0x119   :  { %v319_v33 = vpop.f32.mrb[1].mxu0  ;;  %v415_v34 = vsub.f32 %v408_v0, %v317_v31 }
 0x11a   :  { %v416_v36 = vsub.f32 %v408_v0, %v319_v33 }
 0x11c   :  { %v323_v37 = vpop.f32.mrb[2].mxu0 }
 0x11d   :  { %v419_v38 = vsub.f32 %v413_v35, %v323_v37  ;;  %v325_v39 = vpop.f32.mrb[3].mxu0 }
 0x11e   :  { %v420_v40 = vsub.f32 %v413_v35, %v325_v39 }
 0x11f   :  { %v423_v3 = vmin.f32 %v415_v34, %v419_v38 }
 0x120   :  { %v430_v41 = vmin.f32 %v416_v36, %v420_v40 }
 0x121   :  { %v424_v42 = vrot.slane %v423_v3, 4 }
 0x122   :  { %v431_v43 = vrot.slane %v430_v41, 4 }
 0x123   :  { %v425_v45 = vmin.f32 %v423_v3, %v424_v42 }
 0x124   :  { %v432_v46 = vmin.f32 %v430_v41, %v431_v43 }
 0x125   :  { %v426_v47 = vrot.slane %v425_v45, 2 }
 0x126   :  { %v433_v48 = vrot.slane %v432_v46, 2 }
 0x127   :  { %v427_v50 = vmin.f32 %v425_v45, %v426_v47 }
 0x128   :  { %v434_v51 = vmin.f32 %v432_v46, %v433_v48 }
 0x129   :  { %v428_v52 = vrot.slane %v427_v50, 1 }
 0x12a   :  { %v435_v53 = vrot.slane %v434_v51, 1 }
 0x12b   :  { %v429_v55 = vmin.f32 %v427_v50, %v428_v52 }
 0x12c   :  { %v436_v56 = vmin.f32 %v434_v51, %v435_v53 }
 0x12d   :  { %vm457_vm2 = vcmp.eq.f32.partialorder %v415_v34, %v429_v55  ;;  %vm461_vm3 = vcmp.eq.f32.partialorder %v419_v38, %v429_v55 }
 0x12e   :  { %v465_v57 = vsel %vm457_vm2, %v2077_v49, 16  ;;  %v469_v58 = vsel %vm461_vm3, %v2080_v54, 16  ;;  %vm458_vm4 = vcmp.eq.f32.partialorder %v416_v36, %v436_v56  ;;  %vm462_vm5 = vcmp.eq.f32.partialorder %v420_v40, %v436_v56 }
 0x12f   :  { %vm473_vm6 = vcmp.lt.s32.totalorder %v465_v57, %v469_v58  ;;  %v466_v59 = vsel %vm458_vm4, %v2077_v49, 16  ;;  %v470_v60 = vsel %vm462_vm5, %v2080_v54, 16  ;;  %v1778_v56 = vmov 1966171168  }
 0x130   :  { %vm484_vm7 = vcmp.lt.s32.totalorder %v466_v59, %v470_v60  ;;  %v474_v61 = vsel %vm473_vm6, %v465_v57, %v469_v58  ;;  %v522_v57 = vunpack.c.l.s4 %v1778_v56 }
 0x131   :  { %v485_v62 = vsel %vm484_vm7, %v466_v59, %v470_v60  ;;  %v475_v63 = vrot.slane %v474_v61, 4 }
 0x132   :  { %v486_v1 = vrot.slane %v485_v62, 4 }
 0x133   :  { %vm476_vm8 = vcmp.lt.s32.totalorder %v474_v61, %v475_v63 }
 0x134   :  { %vm487_vm9 = vcmp.lt.s32.totalorder %v485_v62, %v486_v1  ;;  %v477_v2 = vsel %vm476_vm8, %v474_v61, %v475_v63 }
 0x135   :  { %v488_v5 = vsel %vm487_vm9, %v485_v62, %v486_v1  ;;  %v478_v6 = vrot.slane %v477_v2, 2  ;;  %v523_v62 = vunpack.c.0.s8 %v522_v57 }
 0x136   :  { %v489_v7 = vrot.slane %v488_v5, 2 }
 0x137   :  { %v394_v8 = vpop.f32.mrb[0].mxu1  ;;  %vm479_vm10 = vcmp.lt.s32.totalorder %v477_v2, %v478_v6 }
 0x138   :  { %v396_v9 = vpop.f32.mrb[1].mxu1  ;;  %vm490_vm11 = vcmp.lt.s32.totalorder %v488_v5, %v489_v7  ;;  %v480_v10 = vsel %vm479_vm10, %v477_v2, %v478_v6  ;;  %v417_v16 = vsub.f32 %v408_v0, %v394_v8 }
 0x139   :  { %v491_v11 = vsel %vm490_vm11, %v488_v5, %v489_v7  ;;  %v481_v12 = vrot.slane %v480_v10, 1  ;;  %v418_v14 = vsub.f32 %v408_v0, %v396_v9  ;;  %v526_v5 = vsub.s32 %v523_v62, %v2077_v49 }
 0x13a   :  { %v492_v13 = vrot.slane %v491_v11, 1 }
 0x13b   :  { %v400_v15 = vpop.f32.mrb[2].mxu1  ;;  %vm482_vm13 = vcmp.lt.s32.totalorder %v480_v10, %v481_v12  ;;  %v445_v24 = vsel %vm444_vm12, %v418_v14, inf }
 0x13c   :  { %v421_v17 = vsub.f32 %v413_v35, %v400_v15  ;;  %v402_v18 = vpop.f32.mrb[3].mxu1  ;;  %vm493_vm14 = vcmp.lt.s32.totalorder %v491_v11, %v492_v13  ;;  %v2086_v19 = vsel %vm482_vm13, %v480_v10, %v481_v12 }
 0x13d   :  { %v422_v20 = vsub.f32 %v413_v35, %v402_v18  ;;  %v2088_v22 = vsel %vm493_vm14, %v491_v11, %v492_v13  ;;  %vm548_vm11 = vcmp.eq.s32.totalorder %v2077_v49, %v2086_v19  ;;  %vm552_vm14 = vcmp.eq.s32.totalorder %v2080_v54, %v2086_v19 }
 0x13e   :  { %v437_v23 = vmin.f32 %v417_v16, %v421_v17  ;;  %vm549_vm15 = vcmp.eq.s32.totalorder %v2077_v49, %v2088_v22  ;;  %v519_v27 = vcombine.low %v2086_v19, %v2088_v22  ;;  %vm553_vm1 = vcmp.eq.s32.totalorder %v2080_v54, %v2088_v22 }
 0x13f   :  { %v446_v25 = vsel %vm444_vm12, %v422_v20, inf  ;;  %v1339_v26 = vsel %vm549_vm15, 1.0, %v1776_v4  ;;  %v1343_v31 = vsel %vm553_vm1, 1.0, %v1776_v4  ;;  %v1338_v6 = vsel %vm548_vm11, 1.0, %v1776_v4 }
 0x140   :  { %v438_v28 = vrot.slane %v437_v23, 4  ;;  %v447_v29 = vmin.f32 %v445_v24, %v446_v25  ;;  %604 = vxpose.xlu0.b32.start [1/2] (short) %v1339_v26, 128  ;;  %v1342_v8 = vsel %vm552_vm14, 1.0, %v1776_v4 }
 0x142   :  { %v439_v30 = vmin.f32 %v437_v23, %v438_v28  ;;  %v448_v0 = vrot.slane %v447_v29, 4 }
 0x144   :  { %v440_v33 = vrot.slane %v439_v30, 2  ;;  %v449_v34 = vmin.f32 %v447_v29, %v448_v0  ;;  %605 = vxpose.xlu0.b32.end [2/2] (short) %v1343_v31, 128 }
 0x146   :  { %v441_v35 = vmin.f32 %v439_v30, %v440_v33  ;;  %v450_v36 = vrot.slane %v449_v34, 2 }
 0x148   :  { %v442_v37 = vrot.slane %v441_v35, 1  ;;  %v451_v38 = vmin.f32 %v449_v34, %v450_v36 }
 0x14a   :  { %v443_v39 = vmin.f32 %v441_v35, %v442_v37  ;;  %v452_v40 = vrot.slane %v451_v38, 1 }
 0x14c   :  { %vm459_vm2 = vcmp.eq.f32.partialorder %v417_v16, %v443_v39  ;;  %vm463_vm3 = vcmp.eq.f32.partialorder %v421_v17, %v443_v39  ;;  %v453_v3 = vmin.f32 %v451_v38, %v452_v40  ;;  %v1680_v16 = vpack.c.bf16 %v2034_v21, %v1891_v32 }
 0x14d   :  { %v467_v41 = vsel %vm459_vm2, %v2077_v49, 16  ;;  %v471_v42 = vsel %vm463_vm3, %v2080_v54, 16 }
 0x14e   :  { %vm495_vm4 = vcmp.lt.s32.totalorder %v467_v41, %v471_v42  ;;  %vm460_vm5 = vcmp.eq.f32.partialorder %v418_v14, %v453_v3  ;;  %vm464_vm6 = vcmp.eq.f32.partialorder %v422_v20, %v453_v3  ;;  %v527_v14 = vrot.slane %v519_v27, %v526_v5  ;;  %1681 = vmatprep.subr.bf16.mxu0 %v1680_v16 }
 0x14f   :  { %v496_v43 = vsel %vm495_vm4, %v467_v41, %v471_v42  ;;  %v468_v45 = vsel %vm460_vm5, %v2077_v49, 16  ;;  %v472_v46 = vsel %vm464_vm6, %v2080_v54, 16  ;;  %1684 = vmatprep.subr.bf16.mxu1 %v1680_v16  ;;  %vm545_vm4 = vcmp.lt.s32.totalorder %v454_v44, 448  ;;  %1683 = vmatpush3.bf16.msra.mxu0 %v1680_v16 }
 0x150   :  { %v497_v47 = vrot.slane %v496_v43, 4  ;;  %v506_v48 = vsel %vm444_vm12, %v468_v45, 2147483647  ;;  %v507_v50 = vsel %vm444_vm12, %v472_v46, 2147483647  ;;  %1685 = vmatpush3.bf16.msra.mxu1 %v1680_v16  ;;  %vm700_vm6 = vcmask 130048  }
 0x151   :  { %vm508_vm7 = vcmp.lt.s32.totalorder %v506_v48, %v507_v50 }
 0x152   :  { %vm498_vm8 = vcmp.lt.s32.totalorder %v496_v43, %v497_v47  ;;  %v509_v51 = vsel %vm508_vm7, %v506_v48, %v507_v50 }
 0x153   :  { %v499_v52 = vsel %vm498_vm8, %v496_v43, %v497_v47  ;;  %v510_v53 = vrot.slane %v509_v51, 4 }
 0x154   :  { %v500_v55 = vrot.slane %v499_v52, 2 }
 0x155   :  { %vm511_vm9 = vcmp.lt.s32.totalorder %v509_v51, %v510_v53 }
 0x156   :  { %vm501_vm10 = vcmp.lt.s32.totalorder %v499_v52, %v500_v55  ;;  %v512_v58 = vsel %vm511_vm9, %v509_v51, %v510_v53 }
 0x157   :  { %v502_v59 = vsel %vm501_vm10, %v499_v52, %v500_v55  ;;  %v513_v60 = vrot.slane %v512_v58, 2 }
 0x158   :  { %v503_v61 = vrot.slane %v502_v59, 1 }
 0x159   :  { %vm514_vm13 = vcmp.lt.s32.totalorder %v512_v58, %v513_v60 }
 0x15a   :  { %vm504_vm12 = vcmp.lt.s32.totalorder %v502_v59, %v503_v61  ;;  %v515_v63 = vsel %vm514_vm13, %v512_v58, %v513_v60 }
 0x15b   :  { %v505_v1 = vsel %vm504_vm12, %v502_v59, %v503_v61  ;;  %v516_v2 = vrot.slane %v515_v63, 1 }
 0x15c   :  { %vm550_vm15 = vcmp.eq.s32.totalorder %v2077_v49, %v505_v1  ;;  %vm554_vm1 = vcmp.eq.s32.totalorder %v2080_v54, %v505_v1 }
 0x15d   :  { %v1340_v7 = vsel %vm550_vm15, 1.0, %v1776_v4  ;;  %v1344_v9 = vsel %vm554_vm1, 1.0, %v1776_v4  ;;  %vm517_vm2 = vcmp.lt.s32.totalorder %v515_v63, %v516_v2 }
 0x15e   :  { %v1691_v10 = vpack.i.bf16 %v1340_v7, %v1338_v6  ;;  %v1693_v11 = vpack.i.bf16 %v1344_v9, %v1342_v8  ;;  %v518_v12 = vsel %vm517_vm2, %v515_v63, %v516_v2 }
 0x15f   :  { %v520_v13 = vcombine.low %v505_v1, %v518_v12  ;;  %vm555_vm3 = vcmp.eq.s32.totalorder %v2080_v54, %v518_v12  ;;  %vm551_vm5 = vcmp.eq.s32.totalorder %v2077_v49, %v518_v12 }
 0x160   :  { %1692 = vxpose.xlu1.b32.start [1/2] (short) %v1691_v10, 128  ;;  %v1341_v19 = vsel %vm551_vm5, 1.0, %v1776_v4  ;;  %v1345_v32 = vsel %vm555_vm3, 1.0, %v1776_v4 }
 0x161   :  { %v534_v15 = vrot.slane %v520_v13, %v526_v5 }
 0x163   :  { %v535_v17 = vcombine.low %v527_v14, %v534_v15 }
 0x164   :  { %1694 = vxpose.xlu1.b32.end [2/2] (short) %v1693_v11, 128 }
 0x165   :  { %v542_v18 = vrot.slane %v535_v17, %v526_v5 }
 0x167   :  { %547 = vst.msk [vmem:[%s2446_s4] sm:$0xf] %vm545_vm4, %v542_v18 }
 0x19d   :  { %668 = vxpose.xlu1.b32.start [1/2] (short) (narrow) %v1341_v19, 64 }
 0x1a1   :  { %669 = vxpose.xlu1.b32.end [2/2] (short) (narrow) %v1345_v32, 64 }
 0x1c0   :  { %v2135_v20 = vpop.trf.xlu0 }
 0x1c4   :  { %v2144_v54 = vpop.trf.xlu0 }
 0x1c8   :  { %v2151_v26 = vpop.trf.xlu0 }
 0x1cc   :  { %v2156_v0 = vpop.trf.xlu0 }
 0x1d0   :  { %v2160_v37 = vpop.trf.xlu0 }
 0x1d4   :  { %v625_v41 = vpop.trf.xlu0 }
 0x1d8   :  { %v626_v48 = vpop.trf.xlu0 }
 0x1dc   :  { %v627_v55 = vpop.trf.xlu0 }
 0x1e0   :  { %v2132_v21 = vpop.trf.xlu1  ;;  %v628_v61 = vpop.trf.xlu0 }
 0x1e1   :  { %v1696_v44 = vunpack.i.l.bf16 %v2132_v21 }
 0x1e3   :  { %1500 = vmatprep.mubr.msk.f32.mxu0 %vm700_vm6, %v1696_v44 }
 0x1e4   :  { %v2138_v22 = vpop.trf.xlu1  ;;  %v629_v5 = vpop.trf.xlu0 }
 0x1e5   :  { %v1701_v49 = vunpack.i.l.bf16 %v2138_v22 }
 0x1e7   :  { %1501 = vmatmul.mubr.msk.f32.vlgmr.msra.gmra.mrb[4].mxu0 %vm700_vm6, %v1701_v49 }
 0x1e8   :  { %v2142_v23 = vpop.trf.xlu1  ;;  %v630_v11 = vpop.trf.xlu0 }
 0x1e9   :  { %v1706_v4 = vunpack.i.l.bf16 %v2142_v23 }
 0x1eb   :  { %1503 = vmatprep.mubr.msk.f32.mxu0 %vm700_vm6, %v1706_v4  ;;  %v1699_v4 = vunpack.i.h.bf16 %v2132_v21 }
 0x1ec   :  { %v2148_v24 = vpop.trf.xlu1  ;;  %v631_v14 = vpop.trf.xlu0 }
 0x1ed   :  { %v1711_v25 = vunpack.i.l.bf16 %v2148_v24 }
 0x1ef   :  { %1504 = vmatmul.mubr.msk.f32.gmra.mrb[6].mxu0 %vm700_vm6, %v1711_v25  ;;  %v1704_v25 = vunpack.i.h.bf16 %v2138_v22 }
 0x1f0   :  { %v1715_v27 = vpop.trf.xlu1  ;;  %v632_v16 = vpop.trf.xlu0 }
 0x1f1   :  { %v1719_v28 = vunpack.i.h.bf16 %v1715_v27  ;;  %v1716_v29 = vunpack.i.l.bf16 %v1715_v27  ;;  %v1714_v27 = vunpack.i.h.bf16 %v2148_v24 }
 0x1f3   :  { %1506 = vmatprep.mubr.msk.f32.mxu0 %vm700_vm6, %v1716_v29  ;;  %1554 = vmatprep.mubr.msk.f32.mxu1 %vm700_vm6, %v1719_v28 }
 0x1f4   :  { %v1720_v30 = vpop.trf.xlu1  ;;  %v633_v18 = vpop.trf.xlu0 }
 0x1f5   :  { %v1724_v31 = vunpack.i.h.bf16 %v1720_v30  ;;  %v1721_v33 = vunpack.i.l.bf16 %v1720_v30 }
 0x1f7   :  { %1507 = vmatmul.mubr.msk.f32.gmra.mrb[8].mxu0 %vm700_vm6, %v1721_v33  ;;  %1555 = vmatmul.mubr.msk.f32.vlgmr.msra.gmra.mrb[4].mxu1 %vm700_vm6, %v1724_v31 }
 0x1f8   :  { %v1725_v34 = vpop.trf.xlu1  ;;  %v634_v44 = vpop.trf.xlu0 }
 0x1f9   :  { %v1729_v35 = vunpack.i.h.bf16 %v1725_v34  ;;  %v1726_v36 = vunpack.i.l.bf16 %v1725_v34 }
 0x1fb   :  { %1509 = vmatprep.mubr.msk.f32.mxu0 %vm700_vm6, %v1726_v36  ;;  %1557 = vmatprep.mubr.msk.f32.mxu1 %vm700_vm6, %v1729_v35 }
 0x1fc   :  { %v1730_v38 = vpop.trf.xlu1  ;;  %v635_v49 = vpop.trf.xlu0 }
 0x1fd   :  { %v1734_v39 = vunpack.i.h.bf16 %v1730_v38  ;;  %v1731_v40 = vunpack.i.l.bf16 %v1730_v38 }
 0x1ff   :  { %1510 = vmatmul.mubr.msk.f32.gmra.mrb[10].mxu0 %vm700_vm6, %v1731_v40  ;;  %1558 = vmatmul.mubr.msk.f32.gmra.mrb[6].mxu1 %vm700_vm6, %v1734_v39 }
 0x200   :  { %v1735_v3 = vpop.trf.xlu1 }
 0x201   :  { %v1739_v42 = vunpack.i.h.bf16 %v1735_v3  ;;  %v1736_v43 = vunpack.i.l.bf16 %v1735_v3 }
 0x203   :  { %1512 = vmatprep.mubr.msk.f32.mxu0 %vm700_vm6, %v1736_v43  ;;  %1560 = vmatprep.mubr.msk.f32.mxu1 %vm700_vm6, %v1739_v42 }
 0x204   :  { %v1740_v45 = vpop.trf.xlu1 }
 0x205   :  { %v1744_v46 = vunpack.i.h.bf16 %v1740_v45  ;;  %v1741_v47 = vunpack.i.l.bf16 %v1740_v45 }
 0x207   :  { %1513 = vmatmul.mubr.msk.f32.gmra.mrb[12].mxu0 %vm700_vm6, %v1741_v47  ;;  %1561 = vmatmul.mubr.msk.f32.gmra.mrb[8].mxu1 %vm700_vm6, %v1744_v46 }
 0x208   :  { %v1745_v50 = vpop.trf.xlu1 }
 0x209   :  { %v1749_v51 = vunpack.i.h.bf16 %v1745_v50  ;;  %v1746_v52 = vunpack.i.l.bf16 %v1745_v50 }
 0x20b   :  { %1515 = vmatprep.mubr.msk.f32.mxu0 %vm700_vm6, %v1746_v52  ;;  %1563 = vmatprep.mubr.msk.f32.mxu1 %vm700_vm6, %v1749_v51 }
 0x20c   :  { %v1750_v53 = vpop.trf.xlu1 }
 0x20d   :  { %v1754_v56 = vunpack.i.h.bf16 %v1750_v53  ;;  %v1751_v57 = vunpack.i.l.bf16 %v1750_v53 }
 0x20f   :  { %1516 = vmatmul.mubr.msk.f32.gmra.mrb[14].mxu0 %vm700_vm6, %v1751_v57  ;;  %1564 = vmatmul.mubr.msk.f32.gmra.mrb[10].mxu1 %vm700_vm6, %v1754_v56 }
 0x210   :  { %v1755_v58 = vpop.trf.xlu1 }
 0x211   :  { %v1759_v59 = vunpack.i.h.bf16 %v1755_v58  ;;  %v1756_v60 = vunpack.i.l.bf16 %v1755_v58 }
 0x213   :  { %1518 = vmatprep.mubr.msk.f32.mxu0 %vm700_vm6, %v1756_v60  ;;  %1566 = vmatprep.mubr.msk.f32.mxu1 %vm700_vm6, %v1759_v59 }
 0x214   :  { %v1760_v62 = vpop.trf.xlu1 }
 0x215   :  { %v1764_v63 = vunpack.i.h.bf16 %v1760_v62  ;;  %v1761_v1 = vunpack.i.l.bf16 %v1760_v62 }
 0x217   :  { %1519 = vmatmul.mubr.msk.f32.gmra.mrb[16].mxu0 %vm700_vm6, %v1761_v1  ;;  %1567 = vmatmul.mubr.msk.f32.gmra.mrb[12].mxu1 %vm700_vm6, %v1764_v63 }
 0x218   :  { %v1765_v2 = vpop.trf.xlu1 }
 0x219   :  { %v1769_v6 = vunpack.i.h.bf16 %v1765_v2  ;;  %v1766_v7 = vunpack.i.l.bf16 %v1765_v2 }
 0x21b   :  { %1521 = vmatprep.mubr.msk.f32.mxu0 %vm700_vm6, %v1766_v7  ;;  %1569 = vmatprep.mubr.msk.f32.mxu1 %vm700_vm6, %v1769_v6 }
 0x21c   :  { %v1770_v8 = vpop.trf.xlu1 }
 0x21d   :  { %v1774_v9 = vunpack.i.h.bf16 %v1770_v8  ;;  %v1771_v10 = vunpack.i.l.bf16 %v1770_v8 }
 0x21f   :  { %1522 = vmatmul.mubr.msk.f32.gmra.mrb[18].mxu0 %vm700_vm6, %v1771_v10  ;;  %1570 = vmatmul.mubr.msk.f32.gmra.mrb[14].mxu1 %vm700_vm6, %v1774_v9 }
 0x220   :  { %1524 = vmatprep.mubr.msk.f32.mxu0 %vm700_vm6, %v2135_v20  ;;  %v684_v12 = vpop.trf.xlu1 }
 0x221   :  { %1572 = vmatprep.mubr.msk.f32.mxu1 %vm700_vm6, %v684_v12 }
 0x223   :  { %1525 = vmatmul.mubr.msk.f32.gmra.mrb[20].mxu0 %vm700_vm6, %v2144_v54 }
 0x224   :  { %1527 = vmatprep.mubr.msk.f32.mxu0 %vm700_vm6, %v2151_v26  ;;  %v685_v13 = vpop.trf.xlu1  ;;  %v1709_v26 = vunpack.i.h.bf16 %v2142_v23 }
 0x225   :  { %1573 = vmatmul.mubr.msk.f32.gmra.mrb[16].mxu1 %vm700_vm6, %v685_v13 }
 0x227   :  { %1528 = vmatmul.mubr.msk.f32.gmra.mrb[22].mxu0 %vm700_vm6, %v2156_v0 }
 0x228   :  { %1530 = vmatprep.mubr.msk.f32.mxu0 %vm700_vm6, %v2160_v37  ;;  %v686_v15 = vpop.trf.xlu1 }
 0x229   :  { %1575 = vmatprep.mubr.msk.f32.mxu1 %vm700_vm6, %v686_v15 }
 0x22b   :  { %1531 = vmatmul.mubr.msk.f32.gmra.mrb[24].mxu0 %vm700_vm6, %v625_v41 }
 0x22c   :  { %1533 = vmatprep.mubr.msk.f32.mxu0 %vm700_vm6, %v626_v48  ;;  %v687_v17 = vpop.trf.xlu1 }
 0x22d   :  { %1576 = vmatmul.mubr.msk.f32.gmra.mrb[18].mxu1 %vm700_vm6, %v687_v17 }
 0x22f   :  { %1534 = vmatmul.mubr.msk.f32.gmra.mrb[26].mxu0 %vm700_vm6, %v627_v55 }
 0x230   :  { %1536 = vmatprep.mubr.msk.f32.mxu0 %vm700_vm6, %v628_v61  ;;  %v688_v19 = vpop.trf.xlu1 }
 0x231   :  { %1578 = vmatprep.mubr.msk.f32.mxu1 %vm700_vm6, %v688_v19 }
 0x233   :  { %1537 = vmatmul.mubr.msk.f32.gmra.mrb[28].mxu0 %vm700_vm6, %v629_v5 }
 0x234   :  { %1539 = vmatprep.mubr.msk.f32.mxu0 %vm700_vm6, %v630_v11  ;;  %v689_v32 = vpop.trf.xlu1 }
 0x235   :  { %1579 = vmatmul.mubr.msk.f32.gmra.mrb[20].mxu1 %vm700_vm6, %v689_v32 }
 0x237   :  { %1540 = vmatmul.mubr.msk.f32.gmra.mrb[30].mxu0 %vm700_vm6, %v631_v14 }
 0x238   :  { %1542 = vmatprep.mubr.msk.f32.mxu0 %vm700_vm6, %v632_v16  ;;  %v690_v20 = vpop.trf.xlu1 }
 0x239   :  { %1581 = vmatprep.mubr.msk.f32.mxu1 %vm700_vm6, %v690_v20 }
 0x23b   :  { %1543 = vmatmul.mubr.msk.f32.gmra.mrb[32].mxu0 %vm700_vm6, %v633_v18 }
 0x23c   :  { %1545 = vmatprep.mubr.msk.f32.mxu0 %vm700_vm6, %v634_v44  ;;  %v691_v54 = vpop.trf.xlu1 }
 0x23d   :  { %1582 = vmatmul.mubr.msk.f32.gmra.mrb[22].mxu1 %vm700_vm6, %v691_v54 }
 0x23f   :  { %1546 = vmatmul.mubr.msk.f32.gmra.mrb[34].mxu0 %vm700_vm6, %v635_v49 }
 0x240   :  { %1548 = vmatprep.mubr.msk.f32.mxu0 %vm700_vm6, %v1699_v4 }
 0x243   :  { %1549 = vmatmul.mubr.msk.f32.gmra.mrb[36].mxu0 %vm700_vm6, %v1704_v25 }
 0x244   :  { %1551 = vmatprep.mubr.msk.f32.mxu0 %vm700_vm6, %v1709_v26 }
 0x247   :  { %1552 = vmatmul.mubr.msk.f32.gmra.mrb[38].mxu0 %vm700_vm6, %v1714_v27 }
 0x2ba   :  { %v1502_v28 = vpop.f32.mrb[4].mxu0 }
 0x2bb   :  { %1215 = vst.msk [vmem:[%s2447_s3 + $0x8] sm:$0xff] %vm76_vm0, %v1502_v28  ;;  %v935_v21 = vpop.f32.mrb[5].mxu0 }
 0x2bc   :  { %1214 = vst.msk [vmem:[%s2447_s3] sm:$0xff] %vm76_vm0, %v935_v21 }
 0x2c2   :  { %v1505_v22 = vpop.f32.mrb[6].mxu0 }
 0x2c3   :  { %1217 = vst.msk [vmem:[%s2447_s3 + $0x18] sm:$0xff] %vm76_vm0, %v1505_v22  ;;  %v945_v23 = vpop.f32.mrb[7].mxu0 }
 0x2c4   :  { %1216 = vst.msk [vmem:[%s2447_s3 + $0x10] sm:$0xff] %vm76_vm0, %v945_v23 }
 0x2ca   :  { %v1508_v24 = vpop.f32.mrb[8].mxu0  ;;  %v1556_v29 = vpop.f32.mrb[4].mxu1 }
 0x2cb   :  { %1219 = vst.msk [vmem:[%s2447_s3 + $0x28] sm:$0xff] %vm76_vm0, %v1508_v24  ;;  %1251 = vst.msk [vmem:[%s2447_s3 + $0x128] sm:$0xff] %vm76_vm0, %v1556_v29  ;;  %v955_v30 = vpop.f32.mrb[9].mxu0  ;;  %v1115_v0 = vpop.f32.mrb[5].mxu1 }
 0x2cc   :  { %1218 = vst.msk [vmem:[%s2447_s3 + $0x20] sm:$0xff] %vm76_vm0, %v955_v30  ;;  %1250 = vst.msk [vmem:[%s2447_s3 + $0x120] sm:$0xff] %vm76_vm0, %v1115_v0 }
 0x2d2   :  { %v1511_v31 = vpop.f32.mrb[10].mxu0  ;;  %v1559_v33 = vpop.f32.mrb[6].mxu1 }
 0x2d3   :  { %1221 = vst.msk [vmem:[%s2447_s3 + $0x38] sm:$0xff] %vm76_vm0, %v1511_v31  ;;  %1253 = vst.msk [vmem:[%s2447_s3 + $0x138] sm:$0xff] %vm76_vm0, %v1559_v33  ;;  %v965_v34 = vpop.f32.mrb[11].mxu0  ;;  %v1125_v35 = vpop.f32.mrb[7].mxu1 }
 0x2d4   :  { %1220 = vst.msk [vmem:[%s2447_s3 + $0x30] sm:$0xff] %vm76_vm0, %v965_v34  ;;  %1252 = vst.msk [vmem:[%s2447_s3 + $0x130] sm:$0xff] %vm76_vm0, %v1125_v35 }
 0x2da   :  { %v1514_v36 = vpop.f32.mrb[12].mxu0  ;;  %v1562_v37 = vpop.f32.mrb[8].mxu1 }
 0x2db   :  { %1223 = vst.msk [vmem:[%s2447_s3 + $0x48] sm:$0xff] %vm76_vm0, %v1514_v36  ;;  %1255 = vst.msk [vmem:[%s2447_s3 + $0x148] sm:$0xff] %vm76_vm0, %v1562_v37  ;;  %v975_v38 = vpop.f32.mrb[13].mxu0  ;;  %v1135_v39 = vpop.f32.mrb[9].mxu1 }
 0x2dc   :  { %1222 = vst.msk [vmem:[%s2447_s3 + $0x40] sm:$0xff] %vm76_vm0, %v975_v38  ;;  %1254 = vst.msk [vmem:[%s2447_s3 + $0x140] sm:$0xff] %vm76_vm0, %v1135_v39 }
 0x2e2   :  { %v1517_v40 = vpop.f32.mrb[14].mxu0  ;;  %v1565_v3 = vpop.f32.mrb[10].mxu1 }
 0x2e3   :  { %1225 = vst.msk [vmem:[%s2447_s3 + $0x58] sm:$0xff] %vm76_vm0, %v1517_v40  ;;  %1257 = vst.msk [vmem:[%s2447_s3 + $0x158] sm:$0xff] %vm76_vm0, %v1565_v3  ;;  %v985_v41 = vpop.f32.mrb[15].mxu0  ;;  %v1145_v42 = vpop.f32.mrb[11].mxu1 }
 0x2e4   :  { %1224 = vst.msk [vmem:[%s2447_s3 + $0x50] sm:$0xff] %vm76_vm0, %v985_v41  ;;  %1256 = vst.msk [vmem:[%s2447_s3 + $0x150] sm:$0xff] %vm76_vm0, %v1145_v42 }
 0x2ea   :  { %v1520_v43 = vpop.f32.mrb[16].mxu0  ;;  %v1568_v45 = vpop.f32.mrb[12].mxu1 }
 0x2eb   :  { %1227 = vst.msk [vmem:[%s2447_s3 + $0x68] sm:$0xff] %vm76_vm0, %v1520_v43  ;;  %1259 = vst.msk [vmem:[%s2447_s3 + $0x168] sm:$0xff] %vm76_vm0, %v1568_v45  ;;  %v995_v46 = vpop.f32.mrb[17].mxu0  ;;  %v1155_v47 = vpop.f32.mrb[13].mxu1 }
 0x2ec   :  { %1226 = vst.msk [vmem:[%s2447_s3 + $0x60] sm:$0xff] %vm76_vm0, %v995_v46  ;;  %1258 = vst.msk [vmem:[%s2447_s3 + $0x160] sm:$0xff] %vm76_vm0, %v1155_v47 }
 0x2f2   :  { %v1523_v48 = vpop.f32.mrb[18].mxu0  ;;  %v1571_v50 = vpop.f32.mrb[14].mxu1 }
 0x2f3   :  { %1229 = vst.msk [vmem:[%s2447_s3 + $0x78] sm:$0xff] %vm76_vm0, %v1523_v48  ;;  %1261 = vst.msk [vmem:[%s2447_s3 + $0x178] sm:$0xff] %vm76_vm0, %v1571_v50  ;;  %v1005_v51 = vpop.f32.mrb[19].mxu0  ;;  %v1165_v52 = vpop.f32.mrb[15].mxu1 }
 0x2f4   :  { %1228 = vst.msk [vmem:[%s2447_s3 + $0x70] sm:$0xff] %vm76_vm0, %v1005_v51  ;;  %1260 = vst.msk [vmem:[%s2447_s3 + $0x170] sm:$0xff] %vm76_vm0, %v1165_v52 }
 0x2f6   :  { %v1526_v53 = vpop.f32.mrb[20].mxu0 }
 0x2f7   :  { %1231 = vst.msk [vmem:[%s2447_s3 + $0x88] sm:$0xff] %vm76_vm0, %v1526_v53  ;;  %v1015_v55 = vpop.f32.mrb[21].mxu0 }
 0x2f8   :  { %1230 = vst.msk [vmem:[%s2447_s3 + $0x80] sm:$0xff] %vm76_vm0, %v1015_v55  ;;  %v1574_v56 = vpop.f32.mrb[16].mxu1 }
 0x2f9   :  { %1263 = vst.msk [vmem:[%s2447_s3 + $0x188] sm:$0xff] %vm76_vm0, %v1574_v56  ;;  %v1175_v57 = vpop.f32.mrb[17].mxu1 }
 0x2fa   :  { %v1529_v58 = vpop.f32.mrb[22].mxu0  ;;  %1262 = vst.msk [vmem:[%s2447_s3 + $0x180] sm:$0xff] %vm76_vm0, %v1175_v57 }
 0x2fb   :  { %1233 = vst.msk [vmem:[%s2447_s3 + $0x98] sm:$0xff] %vm76_vm0, %v1529_v58  ;;  %v1025_v59 = vpop.f32.mrb[23].mxu0 }
 0x2fc   :  { %1232 = vst.msk [vmem:[%s2447_s3 + $0x90] sm:$0xff] %vm76_vm0, %v1025_v59 }
 0x2fe   :  { %v1532_v60 = vpop.f32.mrb[24].mxu0 }
 0x2ff   :  { %1235 = vst.msk [vmem:[%s2447_s3 + $0xa8] sm:$0xff] %vm76_vm0, %v1532_v60  ;;  %v1035_v61 = vpop.f32.mrb[25].mxu0 }
 0x300   :  { %1234 = vst.msk [vmem:[%s2447_s3 + $0xa0] sm:$0xff] %vm76_vm0, %v1035_v61  ;;  %v1577_v62 = vpop.f32.mrb[18].mxu1 }
 0x301   :  { %1265 = vst.msk [vmem:[%s2447_s3 + $0x198] sm:$0xff] %vm76_vm0, %v1577_v62  ;;  %v1185_v63 = vpop.f32.mrb[19].mxu1 }
 0x302   :  { %v1535_v1 = vpop.f32.mrb[26].mxu0  ;;  %1264 = vst.msk [vmem:[%s2447_s3 + $0x190] sm:$0xff] %vm76_vm0, %v1185_v63 }
 0x303   :  { %1237 = vst.msk [vmem:[%s2447_s3 + $0xb8] sm:$0xff] %vm76_vm0, %v1535_v1  ;;  %v1045_v2 = vpop.f32.mrb[27].mxu0 }
 0x304   :  { %1236 = vst.msk [vmem:[%s2447_s3 + $0xb0] sm:$0xff] %vm76_vm0, %v1045_v2 }
 0x306   :  { %v1538_v5 = vpop.f32.mrb[28].mxu0 }
 0x307   :  { %1239 = vst.msk [vmem:[%s2447_s3 + $0xc8] sm:$0xff] %vm76_vm0, %v1538_v5  ;;  %v1055_v6 = vpop.f32.mrb[29].mxu0 }
 0x308   :  { %1238 = vst.msk [vmem:[%s2447_s3 + $0xc0] sm:$0xff] %vm76_vm0, %v1055_v6  ;;  %v1580_v7 = vpop.f32.mrb[20].mxu1 }
 0x309   :  { %1267 = vst.msk [vmem:[%s2447_s3 + $0x1a8] sm:$0xff] %vm76_vm0, %v1580_v7  ;;  %v1195_v8 = vpop.f32.mrb[21].mxu1 }
 0x30a   :  { %v1541_v9 = vpop.f32.mrb[30].mxu0  ;;  %1266 = vst.msk [vmem:[%s2447_s3 + $0x1a0] sm:$0xff] %vm76_vm0, %v1195_v8 }
 0x30b   :  { %1241 = vst.msk [vmem:[%s2447_s3 + $0xd8] sm:$0xff] %vm76_vm0, %v1541_v9  ;;  %v1065_v10 = vpop.f32.mrb[31].mxu0 }
 0x30c   :  { %1240 = vst.msk [vmem:[%s2447_s3 + $0xd0] sm:$0xff] %vm76_vm0, %v1065_v10 }
 0x30e   :  { %v1544_v11 = vpop.f32.mrb[32].mxu0 }
 0x30f   :  { %1243 = vst.msk [vmem:[%s2447_s3 + $0xe8] sm:$0xff] %vm76_vm0, %v1544_v11  ;;  %v1075_v12 = vpop.f32.mrb[33].mxu0 }
 0x310   :  { %1242 = vst.msk [vmem:[%s2447_s3 + $0xe0] sm:$0xff] %vm76_vm0, %v1075_v12  ;;  %v1583_v13 = vpop.f32.mrb[22].mxu1 }
 0x311   :  { %1269 = vst.msk [vmem:[%s2447_s3 + $0x1b8] sm:$0xff] %vm76_vm0, %v1583_v13  ;;  %v1205_v14 = vpop.f32.mrb[23].mxu1 }
 0x312   :  { %v1547_v15 = vpop.f32.mrb[34].mxu0  ;;  %1268 = vst.msk [vmem:[%s2447_s3 + $0x1b0] sm:$0xff] %vm76_vm0, %v1205_v14 }
 0x313   :  { %1245 = vst.msk [vmem:[%s2447_s3 + $0xf8] sm:$0xff] %vm76_vm0, %v1547_v15  ;;  %v1085_v16 = vpop.f32.mrb[35].mxu0 }
 0x314   :  { %1244 = vst.msk [vmem:[%s2447_s3 + $0xf0] sm:$0xff] %vm76_vm0, %v1085_v16 }
 0x316   :  { %v1550_v17 = vpop.f32.mrb[36].mxu0 }
 0x317   :  { %1247 = vst.msk [vmem:[%s2447_s3 + $0x108] sm:$0xff] %vm76_vm0, %v1550_v17  ;;  %v1095_v18 = vpop.f32.mrb[37].mxu0 }
 0x318   :  { %1246 = vst.msk [vmem:[%s2447_s3 + $0x100] sm:$0xff] %vm76_vm0, %v1095_v18 }
 0x31a   :  { %v1553_v19 = vpop.f32.mrb[38].mxu0 }
 0x31b   :  { %1249 = vst.msk [vmem:[%s2447_s3 + $0x118] sm:$0xff] %vm76_vm0, %v1553_v19  ;;  %v1105_v32 = vpop.f32.mrb[39].mxu0 }
 0x31c   :  { %1248 = vst.msk [vmem:[%s2447_s3 + $0x110] sm:$0xff] %vm76_vm0, %v1105_v32 }

</bundles_post_ra>
